<compile_context>
chip_gen: v6e
topology: v6e:2x2x1
jax: 0.10.0
libtpu: 0.0.40
codegen_flags: <defaults>
</compile_context>

<pallas_src>
from functools import partial

import jax
import jax.numpy as jnp
from jax.experimental import pallas as pl
from jax.experimental.pallas import tpu as pltpu


def _check_layout(z_dim, hid_dim):
    # Lane-dense layout assumptions (see performance review "correctness_concerns").
    assert 2 * hid_dim == 128, "packed layout requires 2*hid_dim == 128 lanes"
    assert 4 * z_dim == 2 * hid_dim, "packed layout requires 4*z_dim == 2*hid_dim"
    assert z_dim % 8 == 0, "z_dim must be sublane-aligned (multiple of 8)"


def _make_kernel(z_dim, hid_dim, batch):
    _check_layout(z_dim, hid_dim)
    Z, H, B = z_dim, hid_dim, batch
    W = 2 * H  # 128-lane slab width

    def kernel(z0_ref, eps_ref, w_ref, b_ref, out_ref, z_state):
        t = pl.program_id(0)

        # Initialize the carried latent state from z_0 on the first grid step.
        @pl.when(t == 0)
        def _():
            z_state[...] = z0_ref[...]

        lane = jax.lax.broadcasted_iota(jnp.int32, (B, W), 1)
        z = z_state[...]                                   # [B, W]; lanes 0:Z = z_{t-1}, rest 0

        # ---- stage 1: h = relu(z @ [w1|w3] + [b1|b3]) --------------------------------
        # weight block rows Z:W are zero, so the padded lanes of z contribute nothing.
        h = jnp.dot(z, w_ref[0:W, :], preferred_element_type=jnp.float32) + b_ref[0:1, :]
        h = jnp.maximum(h, 0.0)                            # [B, W] = [h_gate | h_prop]

        # ---- stage 2: gp = h @ blockdiag(w2, w4) (full-width) + [b2|b4|0] ------------
        gp = jnp.dot(h, w_ref[W:2 * W, :], preferred_element_type=jnp.float32) + b_ref[1:2, :]
        # gp lanes: [0:Z]=gate_pre, [Z:2Z]=proposed_mean, [2Z:4Z]=0
        gate = jax.nn.sigmoid(gp)                          # lanes 0:Z valid
        pm_lo = pltpu.roll(gp, shift=W - Z, axis=1)        # proposed_mean -> lanes 0:Z

        # ---- stage 3 input: [z | relu(pm) | 0 | 0] via one lane-mask select ----------
        x3 = jnp.where(lane < Z, z, jnp.maximum(gp, 0.0))
        # ---- stage 3: ml = x3 @ blockdiag(wmu, wlv) (full-width) + [bmu|blv|0] -------
        ml = jnp.dot(x3, w_ref[2 * W:3 * W, :], preferred_element_type=jnp.float32) + b_ref[2:3, :]
        # ml lanes: [0:Z]=z_mu, [Z:2Z]=logvar, [2Z:4Z]=0
        lv_lo = pltpu.roll(ml, shift=W - Z, axis=1)        # logvar -> lanes 0:Z

        # ---- gating + reparameterization (computed at lanes 0:Z) ---------------------
        mu_lo = (1.0 - gate) * ml + gate * pm_lo           # lanes 0:Z = mu
        eps = eps_ref[...]                                 # [B, W]; lanes 0:Z = eps, rest 0
        lv_safe = jnp.where(lane < Z, lv_lo, 0.0)          # keep exp finite in pad lanes
        zt_lo = mu_lo + eps * jnp.exp(0.5 * lv_safe)       # lanes 0:Z = z_t

        # ---- assemble lane-dense output slab [z_t | mu | logvar | 0] -----------------
        mu_mid = pltpu.roll(mu_lo, shift=Z, axis=1)        # mu     -> lanes Z:2Z
        lv_hi = pltpu.roll(ml, shift=Z, axis=1)            # logvar -> lanes 2Z:3Z
        out_ref[...] = jnp.where(
            lane < Z, zt_lo,
            jnp.where(lane < 2 * Z, mu_mid,
                      jnp.where(lane < 3 * Z, lv_hi, 0.0)))

        # Carry z_t to the next grid step (zero the pad lanes so the dots stay exact).
        z_state[...] = jnp.where(lane < Z, zt_lo, 0.0)

    return kernel


@partial(jax.jit, static_argnames=("z_dim", "hid_dim"))
def gated_transition_rollout(z0, eps_seq, w_packed, b_packed, *, z_dim, hid_dim):
    """Apply the GatedTransition T times inside one pallas_call.

    z0:      [B, Z]      initial latent
    eps_seq: [T, B, Z]   reparameterization noise per step (torch.randn equivalent)
    Returns (z_t, mu, logvar), each [T, B, Z].
    """
    _check_layout(z_dim, hid_dim)
    T, B, Z = eps_seq.shape
    W = 2 * hid_dim

    # Lane-pad once, outside the kernel, so every in-kernel operand is 128 lanes wide.
    z0_p = jnp.zeros((B, W), jnp.float32).at[:, 0:Z].set(z0)
    eps_p = jnp.zeros((T, B, W), jnp.float32).at[:, :, 0:Z].set(eps_seq)

    out = pl.pallas_call(
        _make_kernel(z_dim, hid_dim, B),
        out_shape=jax.ShapeDtypeStruct((T, B, W), jnp.float32),
        grid_spec=pltpu.PrefetchScalarGridSpec(
            num_scalar_prefetch=0,
            grid=(T,),
            in_specs=[
                pl.BlockSpec((B, W), lambda t: (0, 0)),            # z0       (VMEM-resident)
                pl.BlockSpec((None, B, W), lambda t: (t, 0, 0)),   # eps[t]
                pl.BlockSpec((3 * W, W), lambda t: (0, 0)),        # weights  (VMEM-resident)
                pl.BlockSpec((3, W), lambda t: (0, 0)),            # biases   (VMEM-resident)
            ],
            out_specs=pl.BlockSpec((None, B, W), lambda t: (t, 0, 0)),
            scratch_shapes=[pltpu.VMEM((B, W), jnp.float32)],      # carried z_t
        ),
        compiler_params=pltpu.CompilerParams(
            dimension_semantics=("arbitrary",)),                   # serial carry over time
    )(z0_p, eps_p, w_packed, b_packed)

    # Slice the packed slab ONCE after the full-T kernel.
    z_t = out[:, :, 0:Z]
    mu = out[:, :, Z:2 * Z]
    logvar = out[:, :, 2 * Z:3 * Z]
    return z_t, mu, logvar


def gated_transition(z_t_1, eps, w_packed, b_packed, *, z_dim, hid_dim):
    """Single-step forward (the literal nn.Module.forward), implemented as T=1 rollout."""
    z_t, mu, logvar = gated_transition_rollout(
        z_t_1, eps[None], w_packed, b_packed, z_dim=z_dim, hid_dim=hid_dim)
    return z_t[0], mu[0], logvar[0]


def pack_params(params, z_dim, hid_dim):
    """Pack the 12 Linear weights/biases into one [3W, W] weight slab + [3, W] bias slab.

    Weight slab (W = 2*hid_dim = 128 lanes; unused rows/cols are zero):
      rows [0,   W): stage 1  [w1 | w3]            (only rows 0:Z used)
      rows [W,  2W): stage 2  blockdiag(w2, w4)    (output lanes 0:2Z used)
      rows [2W, 3W): stage 3  blockdiag(wmu, wlv)  (rows 0:2Z, output lanes 0:2Z used)
    Bias slab: row0=[b1|b3], row1=[b2|b4|0], row2=[bmu|blv|0].
    """
    _check_layout(z_dim, hid_dim)
    Z, H = z_dim, hid_dim
    W = 2 * H

    w = jnp.zeros((3 * W, W), jnp.float32)
    # stage 1: rows 0:Z = [w1 | w3]
    w = w.at[0:Z, 0:H].set(params["w1"]).at[0:Z, H:W].set(params["w3"])
    # stage 2: blockdiag(w2, w4), padded to full 128 output lanes
    w = w.at[W:W + H, 0:Z].set(params["w2"]) \
         .at[W + H:W + 2 * H, Z:2 * Z].set(params["w4"])
    # stage 3: blockdiag(wmu, wlv), rows 2Z:W and lanes 2Z:W stay zero
    w = w.at[2 * W:2 * W + Z, 0:Z].set(params["wmu"]) \
         .at[2 * W + Z:2 * W + 2 * Z, Z:2 * Z].set(params["wlv"])

    b = jnp.zeros((3, W), jnp.float32)
    b = b.at[0, 0:H].set(params["b1"][0]).at[0, H:W].set(params["b3"][0])
    b = b.at[1, 0:Z].set(params["b2"][0]).at[1, Z:2 * Z].set(params["b4"][0])
    b = b.at[2, 0:Z].set(params["bmu"][0]).at[2, Z:2 * Z].set(params["blv"][0])
    return w, b


def init_params(key, z_dim, hid_dim):
    ks = jax.random.split(key, 10)
    scale = 0.1

    def lin(k, din, dout):
        kw, kb = jax.random.split(k)
        w = scale * jax.random.normal(kw, (din, dout), dtype=jnp.float32)
        b = scale * jax.random.normal(kb, (1, dout), dtype=jnp.float32)
        return w, b

    w1, b1 = lin(ks[0], z_dim, hid_dim)      # gate layer 1
    w2, b2 = lin(ks[1], hid_dim, z_dim)      # gate layer 2
    w3, b3 = lin(ks[2], z_dim, hid_dim)      # proposed_mean layer 1
    w4, b4 = lin(ks[3], hid_dim, z_dim)      # proposed_mean layer 2
    # z_to_mu initialized to identity with zero bias (as in the module __init__)
    wmu = jnp.eye(z_dim, dtype=jnp.float32)
    bmu = jnp.zeros((1, z_dim), dtype=jnp.float32)
    wlv, blv = lin(ks[4], z_dim, z_dim)      # z_to_logvar
    return dict(w1=w1, b1=b1, w2=w2, b2=b2, w3=w3, b3=b3, w4=w4, b4=b4,
                wmu=wmu, bmu=bmu, wlv=wlv, blv=blv)


# ---------------------------- pure-JAX reference ------------------------------------
def reference_step(z, eps, p):
    relu = lambda x: jnp.maximum(x, 0.0)
    gate = jax.nn.sigmoid(relu(z @ p["w1"] + p["b1"]) @ p["w2"] + p["b2"])
    pm = relu(z @ p["w3"] + p["b3"]) @ p["w4"] + p["b4"]
    mu = (1.0 - gate) * (z @ p["wmu"] + p["bmu"]) + gate * pm
    logvar = relu(pm) @ p["wlv"] + p["blv"]
    z_t = mu + eps * jnp.exp(0.5 * logvar)
    return z_t, mu, logvar


def reference_rollout(z0, eps_seq, p):
    def step(z, eps):
        z_t, mu, lv = reference_step(z, eps, p)
        return z_t, (z_t, mu, lv)
    _, (zs, mus, lvs) = jax.lax.scan(step, z0, eps_seq)
    return zs, mus, lvs


if __name__ == "__main__":
    B, Z_DIM, HID_DIM, T = 8, 32, 64, 8      # 2*HID_DIM == 4*Z_DIM == 128 lanes

    key = jax.random.PRNGKey(0)
    k_param, k_z, k_eps = jax.random.split(key, 3)

    params = init_params(k_param, Z_DIM, HID_DIM)
    w_packed, b_packed = pack_params(params, Z_DIM, HID_DIM)    # packed once, host-side

    z0 = jax.random.normal(k_z, (B, Z_DIM), dtype=jnp.float32)
    # torch.randn(z_t_1.size()) equivalent, one draw per rollout step (noise kept external)
    eps_seq = jax.random.normal(k_eps, (T, B, Z_DIM), dtype=jnp.float32)

    # ---- T-step rollout (time loop inside the kernel) ------------------------------
    z_t, mu, logvar = gated_transition_rollout(
        z0, eps_seq, w_packed, b_packed, z_dim=Z_DIM, hid_dim=HID_DIM)
    jax.block_until_ready((z_t, mu, logvar))

    z_r, mu_r, lv_r = reference_rollout(z0, eps_seq, params)
    assert jnp.allclose(z_t, z_r, atol=1e-4, rtol=1e-4)
    assert jnp.allclose(mu, mu_r, atol=1e-4, rtol=1e-4)
    assert jnp.allclose(logvar, lv_r, atol=1e-4, rtol=1e-4)

    # ---- single-step forward (literal module semantics) ----------------------------
    z1, mu1, lv1 = gated_transition(
        z0, eps_seq[0], w_packed, b_packed, z_dim=Z_DIM, hid_dim=HID_DIM)
    z1_r, mu1_r, lv1_r = reference_step(z0, eps_seq[0], params)
    assert jnp.allclose(z1, z1_r, atol=1e-4, rtol=1e-4)
    assert jnp.allclose(mu1, mu1_r, atol=1e-4, rtol=1e-4)
    assert jnp.allclose(lv1, lv1_r, atol=1e-4, rtol=1e-4)

    print("KERNEL_OK")
</pallas_src>

<mosaic_0001>
module attributes {stable_mosaic.version = 11 : i64} {
  func.func @kernel(%arg0: i32, %arg1: memref<8x128xf32, #tpu.memory_space<vmem>>, %arg2: memref<1x8x128xf32, #tpu.memory_space<vmem>>, %arg3: memref<384x128xf32, #tpu.memory_space<vmem>>, %arg4: memref<3x128xf32, #tpu.memory_space<vmem>>, %arg5: memref<1x8x128xf32, #tpu.memory_space<vmem>>, %arg6: memref<8x128xf32, #tpu.memory_space<vmem>>) attributes {dimension_semantics = [#tpu.dimension_semantics<arbitrary>], iteration_bounds = array<i64: 8>, scalar_prefetch = 0 : i64, scratch_operands = 1 : i64, tpu.core_type = #tpu.core_type<tc>, window_params = [{pipeline_mode = #tpu.pipeline_mode<synchronous>, transform_indices = @transform_0, window_bounds = array<i64: 8, 128>}, {transform_indices = @transform_1, window_bounds = array<i64: 1, 8, 128>}, {pipeline_mode = #tpu.pipeline_mode<synchronous>, transform_indices = @transform_2, window_bounds = array<i64: 384, 128>}, {pipeline_mode = #tpu.pipeline_mode<synchronous>, transform_indices = @transform_3, window_bounds = array<i64: 3, 128>}, {transform_indices = @transform_4, window_bounds = array<i64: 1, 8, 128>}]} {
    %c0_i32 = arith.constant 0 : i32
    %0 = arith.cmpi eq, %arg0, %c0_i32 : i32
    %1 = arith.extui %0 : i1 to i32
    %c0_i32_0 = arith.constant 0 : i32
    %2 = arith.cmpi ne, %1, %c0_i32_0 : i32
    scf.if %2 {
      %c0_35 = arith.constant 0 : index
      %c0_36 = arith.constant 0 : index
      %70 = vector.load %arg1[%c0_35, %c0_36] : memref<8x128xf32, #tpu.memory_space<vmem>>, vector<8x128xf32>
      %c0_37 = arith.constant 0 : index
      %c0_38 = arith.constant 0 : index
      %71 = vector.load %arg6[%c0_37, %c0_38] : memref<8x128xf32, #tpu.memory_space<vmem>>, vector<8x128xf32>
      tpu.vector_store %arg6[%c0_37, %c0_38], %70 {strides = array<i32>} : memref<8x128xf32, #tpu.memory_space<vmem>>, vector<8x128xf32>,
    } else {
    }
    %3 = tpu.iota {dimensions = array<i32: 1>} : vector<8x128xi32>
    %c0 = arith.constant 0 : index
    %c0_1 = arith.constant 0 : index
    %4 = vector.load %arg6[%c0, %c0_1] : memref<8x128xf32, #tpu.memory_space<vmem>>, vector<8x128xf32>
    %c0_2 = arith.constant 0 : index
    %c0_3 = arith.constant 0 : index
    %5 = vector.load %arg3[%c0_2, %c0_3] : memref<384x128xf32, #tpu.memory_space<vmem>>, vector<128x128xf32>
    %cst = arith.constant dense<0.000000e+00> : vector<8x128xf32>
    %6 = tpu.matmul %4, %5, %cst {dimension_numbers = #tpu.dot_dimension_numbers<[1], [0], [0], [1], [0, 0, 1, 1], [], []>} : vector<8x128xf32>, vector<128x128xf32>, vector<8x128xf32> -> vector<8x128xf32>
    %c0_4 = arith.constant 0 : index
    %c0_5 = arith.constant 0 : index
    %7 = vector.load %arg4[%c0_4, %c0_5] : memref<3x128xf32, #tpu.memory_space<vmem>>, vector<1x128xf32>
    %8 = vector.broadcast %7 : vector<1x128xf32> to vector<8x128xf32>
    %9 = arith.addf %6, %8 : vector<8x128xf32>
    %cst_6 = arith.constant 0.000000e+00 : f32
    %10 = vector.broadcast %cst_6 : f32 to vector<8x128xf32>
    %11 = arith.maximumf %9, %10 : vector<8x128xf32>
    %c128 = arith.constant 128 : index
    %c0_7 = arith.constant 0 : index
    %12 = vector.load %arg3[%c128, %c0_7] : memref<384x128xf32, #tpu.memory_space<vmem>>, vector<128x128xf32>
    %cst_8 = arith.constant dense<0.000000e+00> : vector<8x128xf32>
    %13 = tpu.matmul %11, %12, %cst_8 {dimension_numbers = #tpu.dot_dimension_numbers<[1], [0], [0], [1], [0, 0, 1, 1], [], []>} : vector<8x128xf32>, vector<128x128xf32>, vector<8x128xf32> -> vector<8x128xf32>
    %c1 = arith.constant 1 : index
    %c0_9 = arith.constant 0 : index
    %14 = vector.load %arg4[%c1, %c0_9] : memref<3x128xf32, #tpu.memory_space<vmem>>, vector<1x128xf32>
    %15 = vector.broadcast %14 : vector<1x128xf32> to vector<8x128xf32>
    %16 = arith.addf %13, %15 : vector<8x128xf32>
    %17 = arith.negf %16 : vector<8x128xf32>
    %18 = math.exp %17 : vector<8x128xf32>
    %cst_10 = arith.constant 1.000000e+00 : f32
    %19 = vector.broadcast %cst_10 : f32 to vector<8x128xf32>
    %20 = arith.addf %19, %18 : vector<8x128xf32>
    %21 = arith.divf %19, %20 : vector<8x128xf32>
    %c96_i32 = arith.constant 96 : i32
    %22 = tpu.dynamic_rotate %16 by %c96_i32 dim 1 : vector<8x128xf32>, i32 -> vector<8x128xf32>
    %c32_i32 = arith.constant 32 : i32
    %23 = vector.broadcast %c32_i32 : i32 to vector<8x128xi32>
    %24 = arith.cmpi slt, %3, %23 : vector<8x128xi32>
    %cst_11 = arith.constant 0.000000e+00 : f32
    %25 = vector.broadcast %cst_11 : f32 to vector<8x128xf32>
    %26 = arith.maximumf %16, %25 : vector<8x128xf32>
    %27 = arith.select %24, %4, %26 : vector<8x128xi1>, vector<8x128xf32>
    %c256 = arith.constant 256 : index
    %c0_12 = arith.constant 0 : index
    %28 = vector.load %arg3[%c256, %c0_12] : memref<384x128xf32, #tpu.memory_space<vmem>>, vector<128x128xf32>
    %cst_13 = arith.constant dense<0.000000e+00> : vector<8x128xf32>
    %29 = tpu.matmul %27, %28, %cst_13 {dimension_numbers = #tpu.dot_dimension_numbers<[1], [0], [0], [1], [0, 0, 1, 1], [], []>} : vector<8x128xf32>, vector<128x128xf32>, vector<8x128xf32> -> vector<8x128xf32>
    %c2 = arith.constant 2 : index
    %c0_14 = arith.constant 0 : index
    %30 = vector.load %arg4[%c2, %c0_14] : memref<3x128xf32, #tpu.memory_space<vmem>>, vector<1x128xf32>
    %31 = vector.broadcast %30 : vector<1x128xf32> to vector<8x128xf32>
    %32 = arith.addf %29, %31 : vector<8x128xf32>
    %c96_i32_15 = arith.constant 96 : i32
    %33 = tpu.dynamic_rotate %32 by %c96_i32_15 dim 1 : vector<8x128xf32>, i32 -> vector<8x128xf32>
    %cst_16 = arith.constant 1.000000e+00 : f32
    %34 = vector.broadcast %cst_16 : f32 to vector<8x128xf32>
    %35 = arith.subf %34, %21 : vector<8x128xf32>
    %36 = arith.mulf %35, %32 : vector<8x128xf32>
    %37 = arith.mulf %21, %22 : vector<8x128xf32>
    %38 = arith.addf %36, %37 : vector<8x128xf32>
    %c0_17 = arith.constant 0 : index
    %c0_18 = arith.constant 0 : index
    %c0_19 = arith.constant 0 : index
    %39 = vector.load %arg2[%c0_17, %c0_18, %c0_19] : memref<1x8x128xf32, #tpu.memory_space<vmem>>, vector<1x8x128xf32>
    %40 = vector.shape_cast %39 : vector<1x8x128xf32> to vector<8x128xf32>
    %c32_i32_20 = arith.constant 32 : i32
    %41 = vector.broadcast %c32_i32_20 : i32 to vector<8x128xi32>
    %42 = arith.cmpi slt, %3, %41 : vector<8x128xi32>
    %cst_21 = arith.constant 0.000000e+00 : f32
    %43 = vector.broadcast %cst_21 : f32 to vector<8x128xf32>
    %44 = arith.select %42, %33, %43 : vector<8x128xi1>, vector<8x128xf32>
    %cst_22 = arith.constant 5.000000e-01 : f32
    %45 = vector.broadcast %cst_22 : f32 to vector<8x128xf32>
    %46 = arith.mulf %45, %44 : vector<8x128xf32>
    %47 = math.exp %46 : vector<8x128xf32>
    %48 = arith.mulf %40, %47 : vector<8x128xf32>
    %49 = arith.addf %38, %48 : vector<8x128xf32>
    %c32_i32_23 = arith.constant 32 : i32
    %50 = tpu.dynamic_rotate %38 by %c32_i32_23 dim 1 : vector<8x128xf32>, i32 -> vector<8x128xf32>
    %c32_i32_24 = arith.constant 32 : i32
    %51 = tpu.dynamic_rotate %32 by %c32_i32_24 dim 1 : vector<8x128xf32>, i32 -> vector<8x128xf32>
    %c32_i32_25 = arith.constant 32 : i32
    %52 = vector.broadcast %c32_i32_25 : i32 to vector<8x128xi32>
    %53 = arith.cmpi slt, %3, %52 : vector<8x128xi32>
    %c64_i32 = arith.constant 64 : i32
    %54 = vector.broadcast %c64_i32 : i32 to vector<8x128xi32>
    %55 = arith.cmpi slt, %3, %54 : vector<8x128xi32>
    %c96_i32_26 = arith.constant 96 : i32
    %56 = vector.broadcast %c96_i32_26 : i32 to vector<8x128xi32>
    %57 = arith.cmpi slt, %3, %56 : vector<8x128xi32>
    %cst_27 = arith.constant 0.000000e+00 : f32
    %58 = vector.broadcast %cst_27 : f32 to vector<8x128xf32>
    %59 = arith.select %57, %51, %58 : vector<8x128xi1>, vector<8x128xf32>
    %60 = arith.select %55, %50, %59 : vector<8x128xi1>, vector<8x128xf32>
    %61 = arith.select %53, %49, %60 : vector<8x128xi1>, vector<8x128xf32>
    %c0_28 = arith.constant 0 : index
    %c0_29 = arith.constant 0 : index
    %c0_30 = arith.constant 0 : index
    %62 = vector.load %arg5[%c0_28, %c0_29, %c0_30] : memref<1x8x128xf32, #tpu.memory_space<vmem>>, vector<1x8x128xf32>
    %63 = vector.shape_cast %62 : vector<1x8x128xf32> to vector<8x128xf32>
    %64 = vector.shape_cast %61 : vector<8x128xf32> to vector<1x8x128xf32>
    tpu.vector_store %arg5[%c0_28, %c0_29, %c0_30], %64 {strides = array<i32>} : memref<1x8x128xf32, #tpu.memory_space<vmem>>, vector<1x8x128xf32>,
    %c32_i32_31 = arith.constant 32 : i32
    %65 = vector.broadcast %c32_i32_31 : i32 to vector<8x128xi32>
    %66 = arith.cmpi slt, %3, %65 : vector<8x128xi32>
    %cst_32 = arith.constant 0.000000e+00 : f32
    %67 = vector.broadcast %cst_32 : f32 to vector<8x128xf32>
    %68 = arith.select %66, %49, %67 : vector<8x128xi1>, vector<8x128xf32>
    %c0_33 = arith.constant 0 : index
    %c0_34 = arith.constant 0 : index
    %69 = vector.load %arg6[%c0_33, %c0_34] : memref<8x128xf32, #tpu.memory_space<vmem>>, vector<8x128xf32>
    tpu.vector_store %arg6[%c0_33, %c0_34], %68 {strides = array<i32>} : memref<8x128xf32, #tpu.memory_space<vmem>>, vector<8x128xf32>,
    return
  }
  func.func @transform_0(%arg0: i32) -> (i32, i32) {
    %c0_i32 = arith.constant 0 : i32
    %c0_i32_0 = arith.constant 0 : i32
    %c0_i32_1 = arith.constant 0 : i32
    return %c0_i32, %c0_i32_0 : i32, i32
  }
  func.func @transform_1(%arg0: i32) -> (i32, i32, i32) {
    %c0_i32 = arith.constant 0 : i32
    %c0_i32_0 = arith.constant 0 : i32
    %c0_i32_1 = arith.constant 0 : i32
    return %arg0, %c0_i32, %c0_i32_0 : i32, i32, i32
  }
  func.func @transform_2(%arg0: i32) -> (i32, i32) {
    %c0_i32 = arith.constant 0 : i32
    %c0_i32_0 = arith.constant 0 : i32
    %c0_i32_1 = arith.constant 0 : i32
    return %c0_i32, %c0_i32_0 : i32, i32
  }
  func.func @transform_3(%arg0: i32) -> (i32, i32) {
    %c0_i32 = arith.constant 0 : i32
    %c0_i32_0 = arith.constant 0 : i32
    %c0_i32_1 = arith.constant 0 : i32
    return %c0_i32, %c0_i32_0 : i32, i32
  }
  func.func @transform_4(%arg0: i32) -> (i32, i32, i32) {
    %c0_i32 = arith.constant 0 : i32
    %c0_i32_0 = arith.constant 0 : i32
    %c0_i32_1 = arith.constant 0 : i32
    return %arg0, %c0_i32, %c0_i32_0 : i32, i32, i32
  }
}

</mosaic_0001>

<bundles_post_ra>
// kernel: gated_transition_rollout.1
= control target key start
LH: loop header
LB: loop body
LE: loop exit
PB: predicated region body
PF: predicated region fallthrough
CT: control target
= control target key end

     0   :  { %9 = vsyncpa [#allocation4], 0  ;;  %s865_s15 = smov 0   ;;  %s987_s0 = inlined_call_operand.vmem [shape: f32[8,128], index: 0, kind: input, shape index: {}]   ;;  %s988_s1 = inlined_call_operand.vmem [shape: f32[8,8,128], index: 1, kind: input, shape index: {}]   ;;  %s989_s2 = inlined_call_operand.hbm [shape: f32[384,128], index: 2, kind: input, shape index: {}]   ;;  %s990_s3 = inlined_call_operand.vmem [shape: f32[3,128], index: 3, kind: input, shape index: {}]   ;;  %s991_s4 = inlined_call_operand.vmem [shape: f32[8,8,128], index: 4, kind: output, shape index: {}]  }
   0x1 LB: > { %s871_s16 = sadd.s32 4294967295, %s831_s15   ;;  %p594_p0 = scmp.ge.s32.totalorder %s831_s15, 1  ;;  %s831_s15 = sphi %s865_s15, %s15_s15  }
   0x2   : > { %p135_p1 = scmp.lt.s32.totalorder %s831_s15, 9  ;;  %s833_s17 = smov [#allocation3]  }
   0x3   : > { %s150_s18 = sshll.u32 %s833_s17, 4  ;;  %p772_p4 = scmp.eq.s32.totalorder %s871_s16, 0  ;;  %s151_s18 = int_to_ptr.vmem [resolvable:$true] %s150_s18 }
   0x4   : > { %p876_p3 = pnand %p594_p0, %p135_p1  ;;  %s806_s20 = scalar_lea.vmem %s151_s18, 6144 }
   0x5   : > { %p807_p8 = scmp.ne.s32.totalorder %s151_s18, %s806_s20  ;;  %p814_p11 = scmp.lt.s32.totalorder %s151_s18, %s151_s18 }
   0x6   : > { %p768_p5 = pneg %p876_p3  ;;  %p815_p12 = scmp.lt.s32.totalorder %s806_s20, %s806_s20 }
   0x8   : > { %p769_p6 = pnand %p772_p4, %p768_p5  ;;  %p816_p13 = por %p815_p12, %p814_p11 }
   0xa   : > { %p797_p7 = pneg %p769_p6 }
   0xc   : > { %p809_p9 = pnand %p807_p8, %p797_p7 }
   0xe   : > { %p810_p10 = pneg %p809_p9 }
  0x10   : > { %p817_p2 = pnand %p816_p13, %p810_p10 }
  0x12   : > { %820 = shalt.err (!%p817_p2)
}
  0x13   : > { %s834_s21 = smov 128   ;;  %s835_s22 = smov 8  }
  0x14   : > { %771 = dma.hbm_to_vmem [thread:$0]  (!%p769_p6), %s989_s2, 6144, %s151_s18, [#allocation4], %s834_s21, %s834_s21, %s835_s22  }
  0x15   : > { %176 = sbr.rel (%p876_p3) target bundleno = 800 (0x320), region = 36 }
  0x1a   : > { %826 = dma.done.wait (%p772_p4), [#allocation4], 6144  }
  0x1b   : > { %828 = vsyncadd (%p772_p4), [#allocation4], 4294961152  ;;  %p200_p0 = scmp.lt.s32.totalorder %s871_s16, 7  ;;  %p993_p1 = scmp.ne.s32.totalorder %s871_s16, 0 }
  0x1d   : > { %s201_s25 = scalar_select %p200_p0, %s871_s16, 7 }
  0x1e   : > { %211 = sbr.rel (%p993_p1) target bundleno = 37 (0x25), region = 44 }
  0x1f   : > { %s599_s26 = sshll.u32 %s201_s25, 3 }
  0x20   : > { %s899_s29 = scalar_lea.vmem %s988_s1, %s599_s26  ;;  %s904_s6 = scalar_lea.vmem %s991_s4, %s599_s26 }
  0x23   : > { %v212_v0 = vld [vmem:[%s987_s0] sm:$0xff] }
  0x24   : > { %213 = vst [vmem:[#allocation2] sm:$0xff] %v212_v0 }
  0x25 PF: > { %v232_v1 = vld [vmem:[#allocation3 + $0x78] sm:$0xff]  ;;  %v836_v2 = vmov 0.0   ;;  %v231_v3 = vld [vmem:[#allocation3 + $0x70] sm:$0xff]  ;;  %vm837_vm0 = vmmov 0   ;;  %v230_v4 = vld [vmem:[#allocation3 + $0x68] sm:$0xff]  ;;  %v214_v56 = vlaneseq  ;;  %s838_s13 = smov 96  }
  0x26   : > { %659 = vmatprep.subr.mxu0 %v836_v2  ;;  %691 = vmatprep.mubr.msk.f32.mxu0 %vm837_vm0, %v836_v2  ;;  %v229_v5 = vld [vmem:[#allocation3 + $0x60] sm:$0xff]  ;;  %v324_v6 = vld [vmem:[#allocation3 + $0xf8] sm:$0xff]  ;;  %v323_v7 = vld [vmem:[#allocation3 + $0xf0] sm:$0xff]  ;;  %s839_s17 = smov 32  }
  0x27   : > { %660 = vmatpush3.msra.mxu0 %v232_v1  ;;  %694 = vmatprep.subr.mxu1 %v836_v2  ;;  %v228_v8 = vld [vmem:[#allocation3 + $0x58] sm:$0xff]  ;;  %v322_v9 = vld [vmem:[#allocation3 + $0xe8] sm:$0xff]  ;;  %v227_v10 = vld [vmem:[#allocation3 + $0x50] sm:$0xff]  ;;  %v215_v58 = vand.u32 127, %v214_v56 }
  0x28   : > { %661 = vmatprep.subr.mxu0 %v836_v2  ;;  %726 = vmatprep.mubr.msk.f32.mxu1 %vm837_vm0, %v836_v2  ;;  %v321_v11 = vld [vmem:[#allocation3 + $0xe0] sm:$0xff]  ;;  %v226_v12 = vld [vmem:[#allocation3 + $0x48] sm:$0xff]  ;;  %v320_v13 = vld [vmem:[#allocation3 + $0xd8] sm:$0xff] }
  0x29   : > { %662 = vmatpush3.msra.mxu0 %v231_v3  ;;  %695 = vmatpush3.msra.mxu1 %v324_v6  ;;  %v225_v14 = vld [vmem:[#allocation3 + $0x40] sm:$0xff]  ;;  %v319_v15 = vld [vmem:[#allocation3 + $0xd0] sm:$0xff]  ;;  %v224_v16 = vld [vmem:[#allocation3 + $0x38] sm:$0xff]  ;;  %vm408_vm1 = vcmp.lt.s32.totalorder %v215_v58, 32  ;;  %vm520_vm2 = vcmp.lt.s32.totalorder %v215_v58, 96  ;;  %vm519_vm3 = vcmp.lt.s32.totalorder %v215_v58, 64 }
  0x2a   : > { %663 = vmatprep.subr.mxu0 %v836_v2  ;;  %696 = vmatprep.subr.mxu1 %v836_v2  ;;  %v318_v17 = vld [vmem:[#allocation3 + $0xc8] sm:$0xff]  ;;  %v223_v18 = vld [vmem:[#allocation3 + $0x30] sm:$0xff]  ;;  %v317_v19 = vld [vmem:[#allocation3 + $0xc0] sm:$0xff] }
  0x2b   : > { %664 = vmatpush3.msra.mxu0 %v230_v4  ;;  %697 = vmatpush3.msra.mxu1 %v323_v7  ;;  %v222_v20 = vld [vmem:[#allocation3 + $0x28] sm:$0xff]  ;;  %v316_v21 = vld [vmem:[#allocation3 + $0xb8] sm:$0xff]  ;;  %v221_v22 = vld [vmem:[#allocation3 + $0x20] sm:$0xff] }
  0x2c   : > { %665 = vmatprep.subr.mxu0 %v836_v2  ;;  %698 = vmatprep.subr.mxu1 %v836_v2  ;;  %v315_v23 = vld [vmem:[#allocation3 + $0xb0] sm:$0xff]  ;;  %v220_v24 = vld [vmem:[#allocation3 + $0x18] sm:$0xff]  ;;  %v314_v25 = vld [vmem:[#allocation3 + $0xa8] sm:$0xff] }
  0x2d   : > { %666 = vmatpush3.msra.mxu0 %v229_v5  ;;  %699 = vmatpush3.msra.mxu1 %v322_v9  ;;  %v219_v26 = vld [vmem:[#allocation3 + $0x10] sm:$0xff]  ;;  %v313_v27 = vld [vmem:[#allocation3 + $0xa0] sm:$0xff]  ;;  %v218_v28 = vld [vmem:[#allocation3 + $0x8] sm:$0xff] }
  0x2e   : > { %667 = vmatprep.subr.mxu0 %v836_v2  ;;  %700 = vmatprep.subr.mxu1 %v836_v2  ;;  %v312_v29 = vld [vmem:[#allocation3 + $0x98] sm:$0xff]  ;;  %v217_v30 = vld [vmem:[#allocation3] sm:$0xff]  ;;  %v311_v32 = vld [vmem:[#allocation3 + $0x90] sm:$0xff] }
  0x2f   : > { %668 = vmatpush3.msra.mxu0 %v228_v8  ;;  %701 = vmatpush3.msra.mxu1 %v321_v11  ;;  %v943_v31 = vld [vmem:[#allocation2] sm:$0xff]  ;;  %v310_v33 = vld [vmem:[#allocation3 + $0x88] sm:$0xff]  ;;  %v309_v34 = vld [vmem:[#allocation3 + $0x80] sm:$0xff] }
  0x30   : > { %669 = vmatprep.subr.mxu0 %v836_v2  ;;  %702 = vmatprep.subr.mxu1 %v836_v2  ;;  %v426_v35 = vld [vmem:[#allocation3 + $0x178] sm:$0xff]  ;;  %v425_v36 = vld [vmem:[#allocation3 + $0x170] sm:$0xff]  ;;  %v424_v37 = vld [vmem:[#allocation3 + $0x168] sm:$0xff] }
  0x31   : > { %670 = vmatpush3.msra.mxu0 %v227_v10  ;;  %703 = vmatpush3.msra.mxu1 %v320_v13  ;;  %v423_v38 = vld [vmem:[#allocation3 + $0x160] sm:$0xff]  ;;  %v422_v39 = vld [vmem:[#allocation3 + $0x158] sm:$0xff]  ;;  %v421_v40 = vld [vmem:[#allocation3 + $0x150] sm:$0xff] }
  0x32   : > { %671 = vmatprep.subr.mxu0 %v836_v2  ;;  %704 = vmatprep.subr.mxu1 %v836_v2  ;;  %v420_v41 = vld [vmem:[#allocation3 + $0x148] sm:$0xff]  ;;  %v419_v42 = vld [vmem:[#allocation3 + $0x140] sm:$0xff]  ;;  %v418_v43 = vld [vmem:[#allocation3 + $0x138] sm:$0xff] }
  0x33   : > { %672 = vmatpush3.msra.mxu0 %v226_v12  ;;  %705 = vmatpush3.msra.mxu1 %v319_v15  ;;  %v417_v44 = vld [vmem:[#allocation3 + $0x130] sm:$0xff]  ;;  %v416_v45 = vld [vmem:[#allocation3 + $0x128] sm:$0xff]  ;;  %v415_v46 = vld [vmem:[#allocation3 + $0x120] sm:$0xff] }
  0x34   : > { %673 = vmatprep.subr.mxu0 %v836_v2  ;;  %706 = vmatprep.subr.mxu1 %v836_v2  ;;  %v414_v47 = vld [vmem:[#allocation3 + $0x118] sm:$0xff]  ;;  %v413_v53 = vld [vmem:[#allocation3 + $0x110] sm:$0xff]  ;;  %v412_v54 = vld [vmem:[#allocation3 + $0x108] sm:$0xff] }
  0x35   : > { %674 = vmatpush3.msra.mxu0 %v225_v14  ;;  %707 = vmatpush3.msra.mxu1 %v318_v17  ;;  %v602_v48 = vld [vmem:[%s990_s3] ss:$0 sm:$0xff]  ;;  %v411_v55 = vld [vmem:[#allocation3 + $0x100] sm:$0xff]  ;;  %v603_v57 = vld [vmem:[%s990_s3 + $0x1] ss:$0 sm:$0xff] }
  0x36   : > { %675 = vmatprep.subr.mxu0 %v836_v2  ;;  %708 = vmatprep.subr.mxu1 %v836_v2  ;;  %v605_v4 = vld [vmem:[%s990_s3 + $0x2] ss:$0 sm:$0xff] }
  0x37   : > { %676 = vmatpush3.msra.mxu0 %v224_v16  ;;  %709 = vmatpush3.msra.mxu1 %v317_v19 }
  0x38   : > { %677 = vmatprep.subr.mxu0 %v836_v2  ;;  %710 = vmatprep.subr.mxu1 %v836_v2 }
  0x39   : > { %678 = vmatpush3.msra.mxu0 %v223_v18  ;;  %711 = vmatpush3.msra.mxu1 %v316_v21  ;;  %v508_v18 = vld [vmem:[%s899_s29] sm:$0xff] }
  0x3a   : > { %679 = vmatprep.subr.mxu0 %v836_v2  ;;  %712 = vmatprep.subr.mxu1 %v836_v2 }
  0x3b   : > { %680 = vmatpush3.msra.mxu0 %v222_v20  ;;  %713 = vmatpush3.msra.mxu1 %v315_v23 }
  0x3c   : > { %681 = vmatprep.subr.mxu0 %v836_v2  ;;  %714 = vmatprep.subr.mxu1 %v836_v2 }
  0x3d   : > { %682 = vmatpush3.msra.mxu0 %v221_v22  ;;  %715 = vmatpush3.msra.mxu1 %v314_v25 }
  0x3e   : > { %683 = vmatprep.subr.mxu0 %v836_v2  ;;  %716 = vmatprep.subr.mxu1 %v836_v2 }
  0x3f   : > { %684 = vmatpush3.msra.mxu0 %v220_v24  ;;  %717 = vmatpush3.msra.mxu1 %v313_v27 }
  0x40   : > { %685 = vmatprep.subr.mxu0 %v836_v2  ;;  %718 = vmatprep.subr.mxu1 %v836_v2 }
  0x41   : > { %686 = vmatpush3.msra.mxu0 %v219_v26  ;;  %719 = vmatpush3.msra.mxu1 %v312_v29 }
  0x42   : > { %687 = vmatprep.subr.mxu0 %v836_v2  ;;  %720 = vmatprep.subr.mxu1 %v836_v2 }
  0x43   : > { %688 = vmatpush3.msra.mxu0 %v218_v28  ;;  %721 = vmatpush3.msra.mxu1 %v311_v32 }
  0x44   : > { %689 = vmatprep.subr.mxu0 %v836_v2  ;;  %722 = vmatprep.subr.mxu1 %v836_v2 }
  0x45   : > { %690 = vmatpush3.msra.mxu0 %v217_v30  ;;  %723 = vmatpush3.msra.mxu1 %v310_v33 }
  0x46   : > { %692 = vmatmul.mubr.f32.vlgmr.msra.gmra.mxu0 %v943_v31  ;;  %729 = vmatprep.subr.mxu0 %v836_v2 }
  0x47   : > { %761 = vmatprep.mubr.msk.f32.mxu0 %vm837_vm0, %v836_v2  ;;  %724 = vmatprep.subr.mxu1 %v836_v2 }
  0x48   : > { %725 = vmatpush3.msra.mxu1 %v309_v34  ;;  %730 = vmatpush3.msra.mxu0 %v426_v35 }
  0x49   : > { %731 = vmatprep.subr.mxu0 %v836_v2 }
  0x4a   : > { %732 = vmatpush3.msra.mxu0 %v425_v36 }
  0x4b   : > { %733 = vmatprep.subr.mxu0 %v836_v2 }
  0x4c   : > { %734 = vmatpush3.msra.mxu0 %v424_v37 }
  0x4d   : > { %735 = vmatprep.subr.mxu0 %v836_v2 }
  0x4e   : > { %736 = vmatpush3.msra.mxu0 %v423_v38 }
  0x4f   : > { %737 = vmatprep.subr.mxu0 %v836_v2 }
  0x50   : > { %738 = vmatpush3.msra.mxu0 %v422_v39 }
  0x51   : > { %739 = vmatprep.subr.mxu0 %v836_v2 }
  0x52   : > { %740 = vmatpush3.msra.mxu0 %v421_v40 }
  0x53   : > { %741 = vmatprep.subr.mxu0 %v836_v2 }
  0x54   : > { %742 = vmatpush3.msra.mxu0 %v420_v41 }
  0x55   : > { %743 = vmatprep.subr.mxu0 %v836_v2 }
  0x56   : > { %744 = vmatpush3.msra.mxu0 %v419_v42 }
  0x57   : > { %745 = vmatprep.subr.mxu0 %v836_v2 }
  0x58   : > { %746 = vmatpush3.msra.mxu0 %v418_v43 }
  0x59   : > { %747 = vmatprep.subr.mxu0 %v836_v2 }
  0x5a   : > { %748 = vmatpush3.msra.mxu0 %v417_v44 }
  0x5b   : > { %749 = vmatprep.subr.mxu0 %v836_v2 }
  0x5c   : > { %750 = vmatpush3.msra.mxu0 %v416_v45 }
  0x5d   : > { %751 = vmatprep.subr.mxu0 %v836_v2 }
  0x5e   : > { %752 = vmatpush3.msra.mxu0 %v415_v46 }
  0x5f   : > { %753 = vmatprep.subr.mxu0 %v836_v2 }
  0x60   : > { %754 = vmatpush3.msra.mxu0 %v414_v47 }
  0x61   : > { %755 = vmatprep.subr.mxu0 %v836_v2 }
  0x62   : > { %756 = vmatpush3.msra.mxu0 %v413_v53 }
  0x63   : > { %757 = vmatprep.subr.mxu0 %v836_v2 }
  0x64   : > { %758 = vmatpush3.msra.mxu0 %v412_v54 }
  0x65   : > { %759 = vmatprep.subr.mxu0 %v836_v2 }
  0x66   : > { %760 = vmatpush3.msra.mxu0 %v411_v55 }
 0x106   : > { %v304_v49 = vpop.f32.mrf.mxu0 }
 0x107   : > { %v305_v50 = vadd.f32 %v602_v48, %v304_v49 }
 0x108   : > { %v693_v51 = vpop.f32.mrf.mxu0 }
 0x109   : > { %v308_v52 = vmax.f32 %v305_v50, 0.0 }
 0x10b   : > { %727 = vmatmul.mubr.f32.vlgmr.msra.gmra.mxu1 %v308_v52 }
 0x1cb   : > { %v396_v59 = vpop.f32.mrf.mxu1 }
 0x1cc   : > { %v397_v60 = vadd.f32 %v603_v57, %v396_v59 }
 0x1cd   : > { %v728_v61 = vpop.f32.mrf.mxu1 }
 0x1ce   : > { %v409_v62 = vmax.f32 %v397_v60, 0.0  ;;  %406 = vrot.lane.b32.xlu0 %v397_v60, %s838_s13  ;;  %v604_v0 = vmul.f32 -1.442695, %v397_v60 }
 0x1d0   : > { %v410_v63 = vsel %vm408_vm1, %v943_v31, %v409_v62  ;;  %789 = vpow2.f32 %v604_v0 }
 0x1d1   : > { %762 = vmatmul.mubr.f32.vlgmr.msra.gmra.mxu0 %v410_v63 }
 0x1dd   : > { %v790_v1 = vpop.eup %789 }
 0x1de   : > { %v403_v2 = vadd.f32 1.0, %v790_v1 }
 0x1e0   : > { %791 = vrcp.f32 %v403_v2 }
 0x1ed   : > { %v792_v3 = vpop.eup %791 }
 0x1ee   : > { %v504_v8 = vsub.f32 1.0, %v792_v3 }
 0x240   : > { %v407_v5 = vpop.permute.xlu0 %406 }
 0x241   : > { %v506_v10 = vmul.f32 %v792_v3, %v407_v5 }
 0x291   : > { %v498_v6 = vpop.f32.mrf.mxu0 }
 0x292   : > { %v499_v7 = vadd.f32 %v605_v4, %v498_v6 }
 0x293   : > { %v763_v9 = vpop.f32.mrf.mxu0 }
 0x294   : > { %v505_v11 = vmul.f32 %v504_v8, %v499_v7  ;;  %517 = vrot.lane.b32.xlu1 %v499_v7, %s839_s17  ;;  %502 = vrot.lane.b32.xlu0 %v499_v7, %s838_s13 }
 0x296   : > { %v507_v12 = vadd.f32 %v506_v10, %v505_v11 }
 0x298   : > { %515 = vrot.lane.b32.xlu1 %v507_v12, %s839_s17 }
 0x306   : > { %v503_v13 = vpop.permute.xlu0 %502  ;;  %v518_v17 = vpop.permute.xlu1 %517 }
 0x307   : > { %v509_v14 = vsel %vm408_vm1, %v503_v13, 0.0  ;;  %v521_v22 = vsel %vm520_vm2, %v518_v17, 0.0 }
 0x308   : > { %v510_v15 = vmul.f32 0.5, %v509_v14 }
 0x30a   : > { %v511_v16 = vmul.f32 1.442695, %v510_v15  ;;  %v516_v21 = vpop.permute.xlu1 %515 }
 0x30b   : > { %v522_v24 = vsel %vm519_vm3, %v516_v21, %v521_v22 }
 0x30c   : > { %793 = vpow2.f32 %v511_v16 }
 0x319   : > { %v794_v19 = vpop.eup %793 }
 0x31a   : > { %v513_v20 = vmul.f32 %v794_v19, %v508_v18 }
 0x31c   : > { %v514_v23 = vadd.f32 %v513_v20, %v507_v12 }
 0x31e   : > { %v523_v25 = vsel %vm408_vm1, %v514_v23, %v522_v24  ;;  %v525_v26 = vsel %vm408_vm1, %v514_v23, 0.0 }
 0x31f   : > { %524 = vst [vmem:[%s904_s6] sm:$0xff] %v523_v25  ;;  %526 = vst [vmem:[#allocation2] sm:$0xff] %v525_v26 }
 0x320 PF: > { %s15_s15 = sadd.s32 1, %s831_s15  }
 0x321   : > { %p12_p2 = scmp.ge.s32.totalorder %s15_s15, 10  }
 0x323   :  { %14 = sbr.rel (!%p12_p2) target bundleno = 1 (0x1), region = 75 }
 0x328   :  { %546 = vsyncpa [#allocation4], 1 }
 0x329   :  { %548 = vsyncpa [#allocation4 + $0x1], 1 }

</bundles_post_ra>
